<compile_context>
chip_gen: v5e
topology: v5e:2x2
jax: 0.10.0
libtpu: 0.0.40
codegen_flags: <defaults>
</compile_context>

<pallas_src>
import math

import jax
import jax.numpy as jnp
from jax.experimental import pallas as pl
from jax.experimental.pallas import tpu as pltpu


# ----------------------------------------------------------------------------
# Tile-size helpers (trace-time; all shapes are static).
# ----------------------------------------------------------------------------
def _lane_tile(total, cap, unit=1):
    """Tile for a lane (last) dim: the full extent, or the largest divisor of
    `total` that is a multiple of lcm(unit, 128) and <= cap."""
    if total <= cap:
        return total
    step = unit * 128 // math.gcd(unit, 128)
    t = (cap // step) * step
    while t >= step:
        if total % t == 0:
            return t
        t -= step
    return total  # fallback: whole extent (VMEM limit is raised below)


def _sublane_tile(total, cap):
    """Tile for a sublane (second-to-last) dim: full extent or a multiple of 8."""
    if total <= cap:
        return total
    t = (cap // 8) * 8
    while t >= 8:
        if total % t == 0:
            return t
        t -= 8
    return total


def _pixel_cap(cin, c1, c2, budget=8 << 20):
    """Max pixels per tile so the f32 intermediates stay within ~budget bytes."""
    per_lane = 4 * (3 * cin + c1 + 2 * c2 + 4)
    return max(256, budget // per_lane)


# ----------------------------------------------------------------------------
# Pass A: conv1 (1x1) + LeakyReLU + conv2 (1x1, no bias), per-channel sum and
#         sum-of-squares for BatchNorm statistics.  Nothing else hits HBM.
# ----------------------------------------------------------------------------
def _stats_kernel(x_ref, w1_ref, b1_ref, w2_ref, sum_ref, sq_ref):
    # x: (Cin, TP)  w1: (C1, Cin)  b1: (C1, 1)  w2: (C2, C1)
    # sum/sq out: (C2, 1) f32, accumulated over the pixel-tile grid axis.
    h1 = jnp.dot(w1_ref[...], x_ref[...], preferred_element_type=jnp.float32)
    h1 = h1 + b1_ref[...]
    h1 = jnp.where(h1 >= 0, h1, 0.2 * h1)                 # LeakyReLU(0.2)
    h2 = jnp.dot(w2_ref[...], h1, preferred_element_type=jnp.float32)

    @pl.when(pl.program_id(1) == 0)                       # first pixel tile of this batch elem
    def _():
        sum_ref[...] = jnp.zeros_like(sum_ref)
        sq_ref[...] = jnp.zeros_like(sq_ref)

    sum_ref[...] += jnp.sum(h2, axis=1, keepdims=True)
    sq_ref[...] += jnp.sum(h2 * h2, axis=1, keepdims=True)


# ----------------------------------------------------------------------------
# Pass B: recompute conv1 + LReLU, folded (BN-scale * conv2) + shift + LReLU,
#         then the C2 -> 1 projection (VPU multiply + sublane reduce) -> logits.
# ----------------------------------------------------------------------------
def _logits_kernel(x_ref, w1_ref, b1_ref, w2_ref, shift_ref, w3_ref, o_ref):
    # x: (Cin, TP)  w2 has the BN scale folded in  shift/w3: (C2, 1)  o: (1, TP)
    h1 = jnp.dot(w1_ref[...], x_ref[...], preferred_element_type=jnp.float32)
    h1 = h1 + b1_ref[...]
    h1 = jnp.where(h1 >= 0, h1, 0.2 * h1)                 # LeakyReLU(0.2)
    hn = jnp.dot(w2_ref[...], h1, preferred_element_type=jnp.float32) + shift_ref[...]
    hn = jnp.where(hn >= 0, hn, 0.2 * hn)                 # LeakyReLU(0.2) after BN
    o_ref[...] = jnp.sum(hn * w3_ref[...], axis=0, keepdims=True)   # (1, TP)


# ----------------------------------------------------------------------------
# Pass C: softmax over the W (lane) axis, written straight into NCHW output.
# ----------------------------------------------------------------------------
def _softmax_kernel(z_ref, o_ref):
    # z, o: (TH, W)
    z = z_ref[...]
    m = jnp.max(z, axis=-1, keepdims=True)
    e = jnp.exp(z - m)
    denom = jnp.sum(e, axis=-1, keepdims=True)
    o_ref[...] = e * pl.reciprocal(denom, approx=True)    # EUP reciprocal


# ----------------------------------------------------------------------------
# Wrapper
# ----------------------------------------------------------------------------
@jax.jit
def pixel_discriminator(x_nchw, params):
    w1, b1, w2, gamma, beta, w3 = params
    n, cin, h, w = x_nchw.shape
    c1 = w1.shape[0]
    c2 = w2.shape[0]
    hw = h * w
    p = n * hw

    # NCHW is already channel-major: (N, C, H*W) is a free view (no transpose).
    x = x_nchw.reshape(n, cin, hw)
    cap = _pixel_cap(cin, c1, c2)

    # ---- Pass A: BatchNorm statistics. ----
    tpa = _lane_tile(hw, cap)
    csum, csq = pl.pallas_call(
        _stats_kernel,
        out_shape=(
            jax.ShapeDtypeStruct((n, c2, 1), jnp.float32),
            jax.ShapeDtypeStruct((n, c2, 1), jnp.float32),
        ),
        grid=(n, hw // tpa),
        in_specs=[
            pl.BlockSpec((None, cin, tpa), lambda i, j: (i, 0, j)),
            pl.BlockSpec((c1, cin), lambda i, j: (0, 0)),
            pl.BlockSpec((c1, 1), lambda i, j: (0, 0)),
            pl.BlockSpec((c2, c1), lambda i, j: (0, 0)),
        ],
        out_specs=(
            pl.BlockSpec((None, c2, 1), lambda i, j: (i, 0, 0)),
            pl.BlockSpec((None, c2, 1), lambda i, j: (i, 0, 0)),
        ),
        compiler_params=pltpu.CompilerParams(
            dimension_semantics=("parallel", "arbitrary"),
            vmem_limit_bytes=64 << 20),
    )(x, w1, b1, w2)

    # ---- BatchNorm (training-mode) finalize: tiny per-channel glue in plain JAX. ----
    # TODO(synk): E[x^2]-E[x]^2 in f32 can cancel for extremely large P; fine at these scales.
    eps = 1e-5
    mean = jnp.sum(csum, axis=0) / float(p)               # (c2, 1)
    var = jnp.sum(csq, axis=0) / float(p) - mean * mean   # biased variance (BN training)
    var = jnp.maximum(var, 0.0)
    scale = gamma / jnp.sqrt(var + eps)                   # (c2, 1)
    shift = beta - mean * scale                           # (c2, 1)
    w2_eff = scale * w2                                   # fold BN scale into conv2 weight

    # ---- Pass B: logits, whole W-rows per tile (lane-dense 1-channel output). ----
    tpb = _lane_tile(hw, cap, unit=w)
    logits = pl.pallas_call(
        _logits_kernel,
        out_shape=jax.ShapeDtypeStruct((n, 1, hw), jnp.float32),
        grid=(n, hw // tpb),
        in_specs=[
            pl.BlockSpec((None, cin, tpb), lambda i, j: (i, 0, j)),
            pl.BlockSpec((c1, cin), lambda i, j: (0, 0)),
            pl.BlockSpec((c1, 1), lambda i, j: (0, 0)),
            pl.BlockSpec((c2, c1), lambda i, j: (0, 0)),
            pl.BlockSpec((c2, 1), lambda i, j: (0, 0)),
            pl.BlockSpec((c2, 1), lambda i, j: (0, 0)),
        ],
        out_specs=pl.BlockSpec((None, 1, tpb), lambda i, j: (i, 0, j)),
        compiler_params=pltpu.CompilerParams(
            dimension_semantics=("parallel", "parallel"),
            vmem_limit_bytes=64 << 20),
    )(x, w1, b1, w2_eff, shift, w3)

    # ---- Pass C: softmax over W. ----
    z4 = logits.reshape(n, 1, h, w)                       # free view
    th = _sublane_tile(h, max(8, (2 << 20) // max(1, 16 * w)))
    out = pl.pallas_call(
        _softmax_kernel,
        out_shape=jax.ShapeDtypeStruct((n, 1, h, w), jnp.float32),
        grid=(n, h // th),
        in_specs=[pl.BlockSpec((None, None, th, w), lambda i, j: (i, 0, j, 0))],
        out_specs=pl.BlockSpec((None, None, th, w), lambda i, j: (i, 0, j, 0)),
        compiler_params=pltpu.CompilerParams(
            dimension_semantics=("parallel", "parallel")),
    )(z4)

    return out


# ----------------------------------------------------------------------------
# Parameters (channel-major (Cout, Cin) 1x1-conv weights) and pure-JAX reference.
# ----------------------------------------------------------------------------
def init_params(key, input_nc, ndf):
    c1, c2 = ndf, 2 * ndf
    k1, k2, k3, k4, k5, k6 = jax.random.split(key, 6)
    w1 = jax.random.normal(k1, (c1, input_nc), jnp.float32) * 0.1
    b1 = jax.random.normal(k2, (c1, 1), jnp.float32) * 0.1
    w2 = jax.random.normal(k3, (c2, c1), jnp.float32) * 0.1
    gamma = 1.0 + 0.1 * jax.random.normal(k4, (c2, 1), jnp.float32)
    beta = 0.1 * jax.random.normal(k5, (c2, 1), jnp.float32)
    w3 = jax.random.normal(k6, (c2, 1), jnp.float32) * 0.1
    return (w1, b1, w2, gamma, beta, w3)


def reference_forward(x_nchw, params):
    w1, b1, w2, gamma, beta, w3 = params
    n, cin, h, w = x_nchw.shape
    xm = jnp.transpose(x_nchw, (0, 2, 3, 1)).reshape(-1, cin)     # (P, Cin)
    h1 = xm @ w1.T + b1[:, 0]
    h1 = jnp.where(h1 >= 0, h1, 0.2 * h1)
    h2 = h1 @ w2.T                                                # (P, C2)
    mean = jnp.mean(h2, axis=0)
    var = jnp.mean((h2 - mean) ** 2, axis=0)                      # biased (BN training)
    hn = (h2 - mean) / jnp.sqrt(var + 1e-5) * gamma[:, 0] + beta[:, 0]
    hn = jnp.where(hn >= 0, hn, 0.2 * hn)
    logits = (hn @ w3[:, 0]).reshape(n, 1, h, w)
    return jax.nn.softmax(logits, axis=-1)


if __name__ == "__main__":
    key = jax.random.PRNGKey(0)
    kx, kp = jax.random.split(key)

    N, INPUT_NC, H, W = 2, 4, 16, 16
    NDF = 16

    x = jax.random.normal(kx, (N, INPUT_NC, H, W), jnp.float32)
    params = init_params(kp, INPUT_NC, NDF)

    y = pixel_discriminator(x, params)
    y = jax.block_until_ready(y)

    assert y.shape == (N, 1, H, W)
    # Softmax over W sums to 1 (approx reciprocal -> slightly loose tolerance).
    assert jnp.allclose(jnp.sum(y, axis=-1), 1.0, atol=5e-3)
    # Match the pure-JAX reference (all-f32 pipeline).
    y_ref = reference_forward(x, params)
    assert float(jnp.max(jnp.abs(y - y_ref))) < 5e-3
    print("KERNEL_OK")
</pallas_src>

<mosaic_0001>
module attributes {stable_mosaic.version = 11 : i64} {
  func.func @_stats_kernel(%arg0: i32, %arg1: i32, %arg2: memref<1x4x256xf32, #tpu.memory_space<vmem>>, %arg3: memref<16x4xf32, #tpu.memory_space<vmem>>, %arg4: memref<16x1xf32, #tpu.memory_space<vmem>>, %arg5: memref<32x16xf32, #tpu.memory_space<vmem>>, %arg6: memref<1x32x1xf32, #tpu.memory_space<vmem>>, %arg7: memref<1x32x1xf32, #tpu.memory_space<vmem>>) attributes {dimension_semantics = [#tpu.dimension_semantics<parallel>, #tpu.dimension_semantics<arbitrary>], iteration_bounds = array<i64: 2, 1>, scalar_prefetch = 0 : i64, scratch_operands = 0 : i64, tpu.core_type = #tpu.core_type<tc>, window_params = [{transform_indices = @transform_0, window_bounds = array<i64: 1, 4, 256>}, {pipeline_mode = #tpu.pipeline_mode<synchronous>, transform_indices = @transform_1, window_bounds = array<i64: 16, 4>}, {pipeline_mode = #tpu.pipeline_mode<synchronous>, transform_indices = @transform_2, window_bounds = array<i64: 16, 1>}, {pipeline_mode = #tpu.pipeline_mode<synchronous>, transform_indices = @transform_3, window_bounds = array<i64: 32, 16>}, {transform_indices = @transform_4, window_bounds = array<i64: 1, 32, 1>}, {transform_indices = @transform_5, window_bounds = array<i64: 1, 32, 1>}]} {
    %c0 = arith.constant 0 : index
    %c0_0 = arith.constant 0 : index
    %0 = vector.load %arg3[%c0, %c0_0] : memref<16x4xf32, #tpu.memory_space<vmem>>, vector<16x4xf32>
    %c0_1 = arith.constant 0 : index
    %c0_2 = arith.constant 0 : index
    %c0_3 = arith.constant 0 : index
    %1 = vector.load %arg2[%c0_1, %c0_2, %c0_3] : memref<1x4x256xf32, #tpu.memory_space<vmem>>, vector<1x4x256xf32>
    %2 = vector.shape_cast %1 : vector<1x4x256xf32> to vector<4x256xf32>
    %cst = arith.constant dense<0.000000e+00> : vector<16x256xf32>
    %3 = tpu.matmul %0, %2, %cst {dimension_numbers = #tpu.dot_dimension_numbers<[1], [0], [0], [1], [0, 0, 1, 1], [], []>} : vector<16x4xf32>, vector<4x256xf32>, vector<16x256xf32> -> vector<16x256xf32>
    %c0_4 = arith.constant 0 : index
    %c0_5 = arith.constant 0 : index
    %4 = vector.load %arg4[%c0_4, %c0_5] : memref<16x1xf32, #tpu.memory_space<vmem>>, vector<16x1xf32>
    %5 = vector.broadcast %4 : vector<16x1xf32> to vector<16x256xf32>
    %6 = arith.addf %3, %5 : vector<16x256xf32>
    %cst_6 = arith.constant 0.000000e+00 : f32
    %7 = vector.broadcast %cst_6 : f32 to vector<16x256xf32>
    %8 = arith.cmpf oge, %6, %7 : vector<16x256xf32>
    %cst_7 = arith.constant 2.000000e-01 : f32
    %9 = vector.broadcast %cst_7 : f32 to vector<16x256xf32>
    %10 = arith.mulf %9, %6 : vector<16x256xf32>
    %11 = arith.select %8, %6, %10 : vector<16x256xi1>, vector<16x256xf32>
    %c0_8 = arith.constant 0 : index
    %c0_9 = arith.constant 0 : index
    %12 = vector.load %arg5[%c0_8, %c0_9] : memref<32x16xf32, #tpu.memory_space<vmem>>, vector<32x16xf32>
    %cst_10 = arith.constant dense<0.000000e+00> : vector<32x256xf32>
    %13 = tpu.matmul %12, %11, %cst_10 {dimension_numbers = #tpu.dot_dimension_numbers<[1], [0], [0], [1], [0, 0, 1, 1], [], []>} : vector<32x16xf32>, vector<16x256xf32>, vector<32x256xf32> -> vector<32x256xf32>
    %c0_i32 = arith.constant 0 : i32
    %14 = arith.cmpi eq, %arg1, %c0_i32 : i32
    %15 = arith.extui %14 : i1 to i32
    %c0_i32_11 = arith.constant 0 : i32
    %16 = arith.cmpi ne, %15, %c0_i32_11 : i32
    scf.if %16 {
      %cst_26 = arith.constant 0.000000e+00 : f32
      %34 = vector.broadcast %cst_26 : f32 to vector<32x1xf32>
      %c0_27 = arith.constant 0 : index
      %c0_28 = arith.constant 0 : index
      %c0_29 = arith.constant 0 : index
      %35 = vector.load %arg6[%c0_27, %c0_28, %c0_29] : memref<1x32x1xf32, #tpu.memory_space<vmem>>, vector<1x32x1xf32>
      %36 = vector.shape_cast %35 : vector<1x32x1xf32> to vector<32x1xf32>
      %37 = vector.shape_cast %34 : vector<32x1xf32> to vector<1x32x1xf32>
      tpu.vector_store %arg6[%c0_27, %c0_28, %c0_29], %37 {strides = array<i32>} : memref<1x32x1xf32, #tpu.memory_space<vmem>>, vector<1x32x1xf32>,
      %cst_30 = arith.constant 0.000000e+00 : f32
      %38 = vector.broadcast %cst_30 : f32 to vector<32x1xf32>
      %c0_31 = arith.constant 0 : index
      %c0_32 = arith.constant 0 : index
      %c0_33 = arith.constant 0 : index
      %39 = vector.load %arg7[%c0_31, %c0_32, %c0_33] : memref<1x32x1xf32, #tpu.memory_space<vmem>>, vector<1x32x1xf32>
      %40 = vector.shape_cast %39 : vector<1x32x1xf32> to vector<32x1xf32>
      %41 = vector.shape_cast %38 : vector<32x1xf32> to vector<1x32x1xf32>
      tpu.vector_store %arg7[%c0_31, %c0_32, %c0_33], %41 {strides = array<i32>} : memref<1x32x1xf32, #tpu.memory_space<vmem>>, vector<1x32x1xf32>,
    } else {
    }
    %c0_12 = arith.constant 0 : index
    %c0_13 = arith.constant 0 : index
    %c0_14 = arith.constant 0 : index
    %17 = vector.load %arg6[%c0_12, %c0_13, %c0_14] : memref<1x32x1xf32, #tpu.memory_space<vmem>>, vector<1x32x1xf32>
    %18 = vector.shape_cast %17 : vector<1x32x1xf32> to vector<32x1xf32>
    %cst_15 = arith.constant dense<0.000000e+00> : vector<32xf32>
    %19 = vector.multi_reduction <add>, %13, %cst_15 [1] : vector<32x256xf32> to vector<32xf32>
    %20 = vector.shape_cast %19 : vector<32xf32> to vector<32x1xf32>
    %21 = arith.addf %18, %20 : vector<32x1xf32>
    %c0_16 = arith.constant 0 : index
    %c0_17 = arith.constant 0 : index
    %c0_18 = arith.constant 0 : index
    %22 = vector.load %arg6[%c0_16, %c0_17, %c0_18] : memref<1x32x1xf32, #tpu.memory_space<vmem>>, vector<1x32x1xf32>
    %23 = vector.shape_cast %22 : vector<1x32x1xf32> to vector<32x1xf32>
    %24 = vector.shape_cast %21 : vector<32x1xf32> to vector<1x32x1xf32>
    tpu.vector_store %arg6[%c0_16, %c0_17, %c0_18], %24 {strides = array<i32>} : memref<1x32x1xf32, #tpu.memory_space<vmem>>, vector<1x32x1xf32>,
    %c0_19 = arith.constant 0 : index
    %c0_20 = arith.constant 0 : index
    %c0_21 = arith.constant 0 : index
    %25 = vector.load %arg7[%c0_19, %c0_20, %c0_21] : memref<1x32x1xf32, #tpu.memory_space<vmem>>, vector<1x32x1xf32>
    %26 = vector.shape_cast %25 : vector<1x32x1xf32> to vector<32x1xf32>
    %27 = arith.mulf %13, %13 : vector<32x256xf32>
    %cst_22 = arith.constant dense<0.000000e+00> : vector<32xf32>
    %28 = vector.multi_reduction <add>, %27, %cst_22 [1] : vector<32x256xf32> to vector<32xf32>
    %29 = vector.shape_cast %28 : vector<32xf32> to vector<32x1xf32>
    %30 = arith.addf %26, %29 : vector<32x1xf32>
    %c0_23 = arith.constant 0 : index
    %c0_24 = arith.constant 0 : index
    %c0_25 = arith.constant 0 : index
    %31 = vector.load %arg7[%c0_23, %c0_24, %c0_25] : memref<1x32x1xf32, #tpu.memory_space<vmem>>, vector<1x32x1xf32>
    %32 = vector.shape_cast %31 : vector<1x32x1xf32> to vector<32x1xf32>
    %33 = vector.shape_cast %30 : vector<32x1xf32> to vector<1x32x1xf32>
    tpu.vector_store %arg7[%c0_23, %c0_24, %c0_25], %33 {strides = array<i32>} : memref<1x32x1xf32, #tpu.memory_space<vmem>>, vector<1x32x1xf32>,
    return
  }
  func.func @transform_0(%arg0: i32, %arg1: i32) -> (i32, i32, i32) {
    %c0_i32 = arith.constant 0 : i32
    %c0_i32_0 = arith.constant 0 : i32
    return %arg0, %c0_i32, %arg1 : i32, i32, i32
  }
  func.func @transform_1(%arg0: i32, %arg1: i32) -> (i32, i32) {
    %c0_i32 = arith.constant 0 : i32
    %c0_i32_0 = arith.constant 0 : i32
    %c0_i32_1 = arith.constant 0 : i32
    return %c0_i32, %c0_i32_0 : i32, i32
  }
  func.func @transform_2(%arg0: i32, %arg1: i32) -> (i32, i32) {
    %c0_i32 = arith.constant 0 : i32
    %c0_i32_0 = arith.constant 0 : i32
    %c0_i32_1 = arith.constant 0 : i32
    return %c0_i32, %c0_i32_0 : i32, i32
  }
  func.func @transform_3(%arg0: i32, %arg1: i32) -> (i32, i32) {
    %c0_i32 = arith.constant 0 : i32
    %c0_i32_0 = arith.constant 0 : i32
    %c0_i32_1 = arith.constant 0 : i32
    return %c0_i32, %c0_i32_0 : i32, i32
  }
  func.func @transform_4(%arg0: i32, %arg1: i32) -> (i32, i32, i32) {
    %c0_i32 = arith.constant 0 : i32
    %c0_i32_0 = arith.constant 0 : i32
    %c0_i32_1 = arith.constant 0 : i32
    return %arg0, %c0_i32, %c0_i32_0 : i32, i32, i32
  }
  func.func @transform_5(%arg0: i32, %arg1: i32) -> (i32, i32, i32) {
    %c0_i32 = arith.constant 0 : i32
    %c0_i32_0 = arith.constant 0 : i32
    %c0_i32_1 = arith.constant 0 : i32
    return %arg0, %c0_i32, %c0_i32_0 : i32, i32, i32
  }
}

module attributes {stable_mosaic.version = 11 : i64} {
  func.func @_logits_kernel(%arg0: i32, %arg1: i32, %arg2: memref<1x4x256xf32, #tpu.memory_space<vmem>>, %arg3: memref<16x4xf32, #tpu.memory_space<vmem>>, %arg4: memref<16x1xf32, #tpu.memory_space<vmem>>, %arg5: memref<32x16xf32, #tpu.memory_space<vmem>>, %arg6: memref<32x1xf32, #tpu.memory_space<vmem>>, %arg7: memref<32x1xf32, #tpu.memory_space<vmem>>, %arg8: memref<1x1x256xf32, #tpu.memory_space<vmem>>) attributes {dimension_semantics = [#tpu.dimension_semantics<parallel>, #tpu.dimension_semantics<parallel>], iteration_bounds = array<i64: 2, 1>, scalar_prefetch = 0 : i64, scratch_operands = 0 : i64, tpu.core_type = #tpu.core_type<tc>, window_params = [{transform_indices = @transform_0, window_bounds = array<i64: 1, 4, 256>}, {pipeline_mode = #tpu.pipeline_mode<synchronous>, transform_indices = @transform_1, window_bounds = array<i64: 16, 4>}, {pipeline_mode = #tpu.pipeline_mode<synchronous>, transform_indices = @transform_2, window_bounds = array<i64: 16, 1>}, {pipeline_mode = #tpu.pipeline_mode<synchronous>, transform_indices = @transform_3, window_bounds = array<i64: 32, 16>}, {pipeline_mode = #tpu.pipeline_mode<synchronous>, transform_indices = @transform_4, window_bounds = array<i64: 32, 1>}, {pipeline_mode = #tpu.pipeline_mode<synchronous>, transform_indices = @transform_5, window_bounds = array<i64: 32, 1>}, {transform_indices = @transform_6, window_bounds = array<i64: 1, 1, 256>}]} {
    %c0 = arith.constant 0 : index
    %c0_0 = arith.constant 0 : index
    %0 = vector.load %arg3[%c0, %c0_0] : memref<16x4xf32, #tpu.memory_space<vmem>>, vector<16x4xf32>
    %c0_1 = arith.constant 0 : index
    %c0_2 = arith.constant 0 : index
    %c0_3 = arith.constant 0 : index
    %1 = vector.load %arg2[%c0_1, %c0_2, %c0_3] : memref<1x4x256xf32, #tpu.memory_space<vmem>>, vector<1x4x256xf32>
    %2 = vector.shape_cast %1 : vector<1x4x256xf32> to vector<4x256xf32>
    %cst = arith.constant dense<0.000000e+00> : vector<16x256xf32>
    %3 = tpu.matmul %0, %2, %cst {dimension_numbers = #tpu.dot_dimension_numbers<[1], [0], [0], [1], [0, 0, 1, 1], [], []>} : vector<16x4xf32>, vector<4x256xf32>, vector<16x256xf32> -> vector<16x256xf32>
    %c0_4 = arith.constant 0 : index
    %c0_5 = arith.constant 0 : index
    %4 = vector.load %arg4[%c0_4, %c0_5] : memref<16x1xf32, #tpu.memory_space<vmem>>, vector<16x1xf32>
    %5 = vector.broadcast %4 : vector<16x1xf32> to vector<16x256xf32>
    %6 = arith.addf %3, %5 : vector<16x256xf32>
    %cst_6 = arith.constant 0.000000e+00 : f32
    %7 = vector.broadcast %cst_6 : f32 to vector<16x256xf32>
    %8 = arith.cmpf oge, %6, %7 : vector<16x256xf32>
    %cst_7 = arith.constant 2.000000e-01 : f32
    %9 = vector.broadcast %cst_7 : f32 to vector<16x256xf32>
    %10 = arith.mulf %9, %6 : vector<16x256xf32>
    %11 = arith.select %8, %6, %10 : vector<16x256xi1>, vector<16x256xf32>
    %c0_8 = arith.constant 0 : index
    %c0_9 = arith.constant 0 : index
    %12 = vector.load %arg5[%c0_8, %c0_9] : memref<32x16xf32, #tpu.memory_space<vmem>>, vector<32x16xf32>
    %cst_10 = arith.constant dense<0.000000e+00> : vector<32x256xf32>
    %13 = tpu.matmul %12, %11, %cst_10 {dimension_numbers = #tpu.dot_dimension_numbers<[1], [0], [0], [1], [0, 0, 1, 1], [], []>} : vector<32x16xf32>, vector<16x256xf32>, vector<32x256xf32> -> vector<32x256xf32>
    %c0_11 = arith.constant 0 : index
    %c0_12 = arith.constant 0 : index
    %14 = vector.load %arg6[%c0_11, %c0_12] : memref<32x1xf32, #tpu.memory_space<vmem>>, vector<32x1xf32>
    %15 = vector.broadcast %14 : vector<32x1xf32> to vector<32x256xf32>
    %16 = arith.addf %13, %15 : vector<32x256xf32>
    %cst_13 = arith.constant 0.000000e+00 : f32
    %17 = vector.broadcast %cst_13 : f32 to vector<32x256xf32>
    %18 = arith.cmpf oge, %16, %17 : vector<32x256xf32>
    %cst_14 = arith.constant 2.000000e-01 : f32
    %19 = vector.broadcast %cst_14 : f32 to vector<32x256xf32>
    %20 = arith.mulf %19, %16 : vector<32x256xf32>
    %21 = arith.select %18, %16, %20 : vector<32x256xi1>, vector<32x256xf32>
    %c0_15 = arith.constant 0 : index
    %c0_16 = arith.constant 0 : index
    %22 = vector.load %arg7[%c0_15, %c0_16] : memref<32x1xf32, #tpu.memory_space<vmem>>, vector<32x1xf32>
    %23 = vector.broadcast %22 : vector<32x1xf32> to vector<32x256xf32>
    %24 = arith.mulf %21, %23 : vector<32x256xf32>
    %cst_17 = arith.constant dense<0.000000e+00> : vector<256xf32>
    %25 = vector.multi_reduction <add>, %24, %cst_17 [0] : vector<32x256xf32> to vector<256xf32>
    %26 = vector.shape_cast %25 : vector<256xf32> to vector<1x256xf32>
    %c0_18 = arith.constant 0 : index
    %c0_19 = arith.constant 0 : index
    %c0_20 = arith.constant 0 : index
    %27 = vector.load %arg8[%c0_18, %c0_19, %c0_20] : memref<1x1x256xf32, #tpu.memory_space<vmem>>, vector<1x1x256xf32>
    %28 = vector.shape_cast %27 : vector<1x1x256xf32> to vector<1x256xf32>
    %29 = vector.shape_cast %26 : vector<1x256xf32> to vector<1x1x256xf32>
    tpu.vector_store %arg8[%c0_18, %c0_19, %c0_20], %29 {strides = array<i32>} : memref<1x1x256xf32, #tpu.memory_space<vmem>>, vector<1x1x256xf32>,
    return
  }
  func.func @transform_0(%arg0: i32, %arg1: i32) -> (i32, i32, i32) {
    %c0_i32 = arith.constant 0 : i32
    %c0_i32_0 = arith.constant 0 : i32
    return %arg0, %c0_i32, %arg1 : i32, i32, i32
  }
  func.func @transform_1(%arg0: i32, %arg1: i32) -> (i32, i32) {
    %c0_i32 = arith.constant 0 : i32
    %c0_i32_0 = arith.constant 0 : i32
    %c0_i32_1 = arith.constant 0 : i32
    return %c0_i32, %c0_i32_0 : i32, i32
  }
  func.func @transform_2(%arg0: i32, %arg1: i32) -> (i32, i32) {
    %c0_i32 = arith.constant 0 : i32
    %c0_i32_0 = arith.constant 0 : i32
    %c0_i32_1 = arith.constant 0 : i32
    return %c0_i32, %c0_i32_0 : i32, i32
  }
  func.func @transform_3(%arg0: i32, %arg1: i32) -> (i32, i32) {
    %c0_i32 = arith.constant 0 : i32
    %c0_i32_0 = arith.constant 0 : i32
    %c0_i32_1 = arith.constant 0 : i32
    return %c0_i32, %c0_i32_0 : i32, i32
  }
  func.func @transform_4(%arg0: i32, %arg1: i32) -> (i32, i32) {
    %c0_i32 = arith.constant 0 : i32
    %c0_i32_0 = arith.constant 0 : i32
    %c0_i32_1 = arith.constant 0 : i32
    return %c0_i32, %c0_i32_0 : i32, i32
  }
  func.func @transform_5(%arg0: i32, %arg1: i32) -> (i32, i32) {
    %c0_i32 = arith.constant 0 : i32
    %c0_i32_0 = arith.constant 0 : i32
    %c0_i32_1 = arith.constant 0 : i32
    return %c0_i32, %c0_i32_0 : i32, i32
  }
  func.func @transform_6(%arg0: i32, %arg1: i32) -> (i32, i32, i32) {
    %c0_i32 = arith.constant 0 : i32
    %c0_i32_0 = arith.constant 0 : i32
    return %arg0, %c0_i32, %arg1 : i32, i32, i32
  }
}

module attributes {stable_mosaic.version = 11 : i64} {
  func.func @_softmax_kernel(%arg0: i32, %arg1: i32, %arg2: memref<1x1x16x16xf32, #tpu.memory_space<vmem>>, %arg3: memref<1x1x16x16xf32, #tpu.memory_space<vmem>>) attributes {dimension_semantics = [#tpu.dimension_semantics<parallel>, #tpu.dimension_semantics<parallel>], iteration_bounds = array<i64: 2, 1>, scalar_prefetch = 0 : i64, scratch_operands = 0 : i64, tpu.core_type = #tpu.core_type<tc>, window_params = [{transform_indices = @transform_0, window_bounds = array<i64: 1, 1, 16, 16>}, {transform_indices = @transform_1, window_bounds = array<i64: 1, 1, 16, 16>}]} {
    %c0 = arith.constant 0 : index
    %c0_0 = arith.constant 0 : index
    %c0_1 = arith.constant 0 : index
    %c0_2 = arith.constant 0 : index
    %0 = vector.load %arg2[%c0, %c0_0, %c0_1, %c0_2] : memref<1x1x16x16xf32, #tpu.memory_space<vmem>>, vector<1x1x16x16xf32>
    %1 = vector.shape_cast %0 : vector<1x1x16x16xf32> to vector<16x16xf32>
    %cst = arith.constant dense<0xFF800000> : vector<16xf32>
    %2 = vector.multi_reduction <maximumf>, %1, %cst [1] : vector<16x16xf32> to vector<16xf32>
    %3 = vector.shape_cast %2 : vector<16xf32> to vector<16x1xf32>
    %4 = vector.broadcast %3 : vector<16x1xf32> to vector<16x16xf32>
    %5 = arith.subf %1, %4 : vector<16x16xf32>
    %6 = math.exp %5 : vector<16x16xf32>
    %cst_3 = arith.constant dense<0.000000e+00> : vector<16xf32>
    %7 = vector.multi_reduction <add>, %6, %cst_3 [1] : vector<16x16xf32> to vector<16xf32>
    %8 = vector.shape_cast %7 : vector<16xf32> to vector<16x1xf32>
    %9 = tpu.reciprocal %8 {approx = true} : vector<16x1xf32> -> vector<16x1xf32>
    %10 = vector.broadcast %9 : vector<16x1xf32> to vector<16x16xf32>
    %11 = arith.mulf %6, %10 : vector<16x16xf32>
    %c0_4 = arith.constant 0 : index
    %c0_5 = arith.constant 0 : index
    %c0_6 = arith.constant 0 : index
    %c0_7 = arith.constant 0 : index
    %12 = vector.load %arg3[%c0_4, %c0_5, %c0_6, %c0_7] : memref<1x1x16x16xf32, #tpu.memory_space<vmem>>, vector<1x1x16x16xf32>
    %13 = vector.shape_cast %12 : vector<1x1x16x16xf32> to vector<16x16xf32>
    %14 = vector.shape_cast %11 : vector<16x16xf32> to vector<1x1x16x16xf32>
    tpu.vector_store %arg3[%c0_4, %c0_5, %c0_6, %c0_7], %14 {strides = array<i32>} : memref<1x1x16x16xf32, #tpu.memory_space<vmem>>, vector<1x1x16x16xf32>,
    return
  }
  func.func @transform_0(%arg0: i32, %arg1: i32) -> (i32, i32, i32, i32) {
    %c0_i32 = arith.constant 0 : i32
    %c0_i32_0 = arith.constant 0 : i32
    %c0_i32_1 = arith.constant 0 : i32
    return %arg0, %c0_i32, %arg1, %c0_i32_0 : i32, i32, i32, i32
  }
  func.func @transform_1(%arg0: i32, %arg1: i32) -> (i32, i32, i32, i32) {
    %c0_i32 = arith.constant 0 : i32
    %c0_i32_0 = arith.constant 0 : i32
    %c0_i32_1 = arith.constant 0 : i32
    return %arg0, %c0_i32, %arg1, %c0_i32_0 : i32, i32, i32, i32
  }
}

</mosaic_0001>

<bundles_post_ra>
// kernel: pixel_discriminator.5
= control target key start
LH: loop header
LB: loop body
LE: loop exit
PB: predicated region body
PF: predicated region fallthrough
CT: control target
= control target key end

     0   :  { %6 = vsyncpa [#allocation3], 0  ;;  %s545_s0 = inlined_call_operand.vmem [shape: f32[2,1,16,16], index: 0, kind: input, shape index: {}]   ;;  %s546_s1 = inlined_call_operand.hbm [shape: f32[2,1,16,16], index: 1, kind: output, shape index: {}]  }
   0x1   :  { %8 = vsyncpa [#allocation3 + $0x1], 0  ;;  %s442_s6 = smov 0   ;;  %s444_s7 = smov 0  }
   0x2   :  { %s446_s8 = smov 0   ;;  %s448_s9 = smov 0  }
   0x3   :  { %s450_s10 = smov 0   ;;  %s452_s11 = smov 0  }
   0x4 LB: > { %s270_s12 = sadd.s32 4294967295, %s428_s11   ;;  %s271_s13 = sadd.s32 4294967294, %s428_s11   ;;  %s428_s11 = sphi %s452_s11, %s14_s11   ;;  %s424_s10 = sphi %s450_s10, %s553_s10   ;;  %s420_s9 = sphi %s448_s9, %s552_s9   ;;  %s416_s8 = sphi %s446_s8, %s551_s8   ;;  %s412_s7 = sphi %s444_s7, %s550_s7   ;;  %s408_s6 = sphi %s442_s6, %s549_s6  }
   0x5   : > { %s26_s14 = sadd.s32 1, %s424_s10  ;;  %s63_s15 = sadd.s32 1, %s416_s8 }
   0x6   : > { %p28_p0 = scmp.ge.s32.totalorder %s26_s14, 2  ;;  %p73_p1 = scmp.ne.s32.totalorder %s416_s8, %s412_s7 }
   0x7   : > { %p74_p2 = scmp.eq.s32.totalorder %s270_s12, 1  ;;  %p79_p3 = scmp.ne.s32.totalorder %s412_s7, %s408_s6 }
   0x8   : > { %s555_s14 = smov (%p28_p0, %s26_s14), 0  ;;  %p80_p5 = scmp.eq.s32.totalorder %s271_s13, 1 }
   0x9   : > { %p482_p4 = por %p74_p2, %p73_p1  ;;  %s58_s17 = ssub.s32 %s424_s10, %s555_s14 }
   0xa   : > { %p274_p6 = scmp.ge.s32.totalorder %s428_s11, 1  ;;  %p61_p7 = scmp.eq.s32.totalorder %s58_s17, 0 }
   0xb   : > { %p489_p8 = por %p80_p5, %p79_p3  ;;  %p111_p9 = scmp.lt.s32.totalorder %s428_s11, 3 }
   0xc   : > { %s495_s19 = scalar_select %p61_p7, %s416_s8, %s63_s15  }
   0xd   : > { %p112_p10 = pnand %p274_p6, %p111_p9 }
   0xe   : > { %p136_p11 = scmp.lt.s32.totalorder (!%p112_p10), %s420_s9, 1  ;;  %s132_s25 = sand.u32 (!%p112_p10), 1, %s412_s7  }
   0xf   : > { %115 = sbr.rel (%p112_p10) target bundleno = 291 (0x123), region = 24  ;;  %s275_s26 = sshll.u32 (!%p112_p10), %s132_s25, 4 }
  0x10   : > { %s284_s27 = sshll.u32 (!%p112_p10), %s420_s9, 4  ;;  %s134_s2 = scalar_lea.vmem (!%p112_p10), [#allocation2], %s275_s26 }
  0x11   : > { %s187_s30 = scalar_lea.hbm (!%p112_p10), %s546_s1, %s284_s27  ;;  %s188_s3 = sshll.u32 (!%p112_p10), %s134_s2, 4  ;;  %s189_s3 = int_to_ptr.vmem [resolvable:$true] %s188_s3 }
  0x12   : > { %s190_s4 = sshll.u32 (!%p112_p10), %s187_s30, 4  ;;  %s174_s5 = scalar_lea.sflag (!%p112_p10), [#allocation3], %s132_s25  ;;  %s191_s4 = int_to_ptr.hbm [resolvable:$true] %s190_s4 }
  0x13   : > { %s370_s17 = scalar_lea.hbm (!%p112_p10), %s546_s1, 32 }
  0x14   : > { %s137_s20 = scalar_select %p136_p11, %s420_s9, 1  ;;  %vm148_vm0 = vcmask 130048  }
  0x15   : > { %s364_s9 = sshra.s32 %s191_s4, 4  ;;  %s365_s9 = int_to_ptr.hbm [resolvable:$true] %s364_s9 }
  0x16   : > { %s283_s21 = sshll.u32 %s137_s20, 4  ;;  %s366_s12 = scalar_lea.hbm %s365_s9, 16 }
  0x17   : > { %s143_s24 = scalar_lea.vmem %s545_s0, %s283_s21  ;;  %p367_p12 = scmp.ne.s32.totalorder %s365_s9, %s366_s12 }
  0x18   : > { %v146_v0 = vld [vmem:[%s143_s24] sm:$0xff]  ;;  %v147_v2 = vld [vmem:[%s143_s24 + $0x8] sm:$0xff]  ;;  %p371_p1 = scmp.lt.s32.totalorder %s365_s9, %s546_s1  ;;  %p372_p2 = scmp.lt.s32.totalorder %s370_s17, %s366_s12 }
  0x19   : > { %v149_v1 = vsel %vm148_vm0, %v146_v0, -inf  ;;  %v152_v3 = vsel %vm148_vm0, %v147_v2, -inf  ;;  %p368_p13 = pnand %p367_p12, %p482_p4 }
  0x1a   : > { %150 = vmax.xlane.f32.xlu0 %v149_v1  ;;  %p373_p3 = por %p372_p2, %p371_p1 }
  0x1b   : > { %p369_p0 = pneg %p368_p13 }
  0x1d   : > { %p374_p5 = pnand %p373_p3, %p369_p0 }
  0x22   : > { %153 = vmax.xlane.f32.xlu0 %v152_v3 }
  0x8d   : > { %v151_v4 = vpop.xlane.xlu0 %150 }
  0x8e   : > { %v155_v5 = vsub.f32 %v146_v0, %v151_v4 }
  0x90   : > { %v157_v6 = vmul.f32 1.442695, %v155_v5 }
  0x92   : > { %342 = vpow2.f32 %v157_v6 }
  0x95   : > { %v154_v7 = vpop.xlane.xlu0 %153 }
  0x96   : > { %v156_v8 = vsub.f32 %v147_v2, %v154_v7 }
  0x98   : > { %v343_v9 = vpop.eup %342  ;;  %v159_v10 = vmul.f32 1.442695, %v156_v8 }
  0x99   : > { %v161_v11 = vsel %vm148_vm0, %v343_v9, 0.0 }
  0x9a   : > { %344 = vpow2.f32 %v159_v10  ;;  %162 = vadd.xlane.f32.xlu1 %v161_v11 }
  0xa0   : > { %v345_v12 = vpop.eup %344 }
  0xa1   : > { %v164_v13 = vsel %vm148_vm0, %v345_v12, 0.0 }
  0xa2   : > { %165 = vadd.xlane.f32.xlu1 %v164_v13 }
 0x10d   : > { %v163_v14 = vpop.xlane.xlu1 %162 }
 0x10e   : > { %346 = vrcp.f32 %v163_v14 }
 0x114   : > { %v347_v15 = vpop.eup %346 }
 0x115   : > { %v169_v16 = vmul.f32 %v347_v15, %v343_v9  ;;  %v166_v17 = vpop.xlane.xlu1 %165 }
 0x116   : > { %348 = vrcp.f32 %v166_v17 }
 0x117   : > { %171 = vst.msk [vmem:[%s134_s2] sm:$0xff] %vm148_vm0, %v169_v16 }
 0x11c   : > { %v349_v18 = vpop.eup %348 }
 0x11d   : > { %v170_v19 = vmul.f32 %v349_v18, %v345_v12 }
 0x11f   : > { %172 = vst.msk [vmem:[%s134_s2 + $0x8] sm:$0xff] %vm148_vm0, %v170_v19 }
 0x120   : > { %377 = shalt.err (!%p374_p5)
}
 0x121   : > { %s430_s22 = smov 128   ;;  %s431_s23 = smov 8  }
 0x122   : > { %285 = dma.vmem_to_hbm [thread:$0]  (%p482_p4), %s189_s3, 256, %s191_s4, %s174_s5, %s430_s22, %s430_s22, %s431_s23  }
 0x123 PF: > { %p291_p6 = scmp.ge.s32.totalorder %s428_s11, 2  ;;  %s205_s24 = sand.u32 1, %s408_s6  }
 0x124   : > { %s206_s25 = scalar_lea.sflag [#allocation3], %s205_s24 }
 0x125   : > { %p288_p7 = pnand %p291_p6, %p489_p8 }
 0x127   : > { %p289_p9 = pneg %p288_p7 }
 0x129   : > { %403 = dma.done.wait (%p289_p9), %s206_s25, 256  }
 0x12a   : > { %405 = vsyncadd (%p289_p9), %s206_s25, 4294967040  ;;  %s14_s11 = sadd.s32 1, %s428_s11   ;;  %s549_s6 = smov %s412_s7 }
 0x12b   : > { %p11_p10 = scmp.ge.s32.totalorder %s14_s11, 4   ;;  %s550_s7 = smov %s416_s8 }
 0x12c   : > { %s551_s8 = smov %s495_s19  ;;  %s552_s9 = smov %s424_s10 }
 0x12d   : > { %s553_s10 = smov %s555_s14  ;;  %13 = sbr.rel (!%p11_p10) target bundleno = 4 (0x4), region = 59 }
 0x132   :  { %212 = vsyncpa [#allocation3], 1 }
 0x133   :  { %214 = vsyncpa [#allocation3 + $0x1], 1 }

// kernel: pixel_discriminator.3
= control target key start
LH: loop header
LB: loop body
LE: loop exit
PB: predicated region body
PF: predicated region fallthrough
CT: control target
= control target key end

     0   :  { %s719_s18 = smov 0   ;;  %s721_s19 = smov 0   ;;  %s835_s0 = inlined_call_operand.vmem [shape: f32[2,4,256], index: 0, kind: input, shape index: {}]   ;;  %s836_s1 = inlined_call_operand.vmem [shape: f32[16,4], index: 1, kind: input, shape index: {}]   ;;  %s837_s2 = inlined_call_operand.vmem [shape: f32[16,1], index: 2, kind: input, shape index: {}]   ;;  %s838_s3 = inlined_call_operand.vmem [shape: f32[32,16], index: 3, kind: input, shape index: {}]   ;;  %s839_s4 = inlined_call_operand.vmem [shape: f32[2,32,1], index: 4, kind: output, shape index: {0}]   ;;  %s840_s5 = inlined_call_operand.vmem [shape: f32[2,32,1], index: 5, kind: output, shape index: {1}]  }
   0x1   :  { %s723_s20 = smov 0  }
   0x2 LB: > { %s28_s21 = sadd.s32 1, %s681_s19  ;;  %p606_p0 = scmp.ge.s32.totalorder %s685_s20, 1  ;;  %s685_s20 = sphi %s723_s20, %s16_s20   ;;  %s681_s19 = sphi %s721_s19, %s842_s19   ;;  %s677_s18 = sphi %s719_s18, %s841_s18  }
   0x3   : > { %p30_p1 = scmp.ge.s32.totalorder %s28_s21, 2  ;;  %p209_p2 = scmp.lt.s32.totalorder %s685_s20, 3 }
   0x5   : > { %s844_s21 = smov (%p30_p1, %s28_s21), 0  ;;  %p210_p3 = pnand %p606_p0, %p209_p2 }
   0x6   : > { %p247_p4 = scmp.lt.s32.totalorder (!%p210_p3), %s677_s18, 1 }
   0x7   : > { %213 = sbr.rel (%p210_p3) target bundleno = 446 (0x1be), region = 36 }
   0xc   : > { %v270_v0 = vld [vmem:[%s837_s2 + $0x8] sm:$0xff]  ;;  %v687_v1 = vmov 0   ;;  %s846_s18 = smov (!%p247_p4, %s677_s18), 1  ;;  %v269_v3 = vld [vmem:[%s837_s2] sm:$0xff]  ;;  %vm292_vm0 = vcmask 1043456   ;;  %vm285_vm1 = vcmask 31744  }
   0xd   : > { %662 = vset.pattern.permute.xlu0 %v687_v1  ;;  %s629_s24 = sshll.u32 %s846_s18, 3  ;;  %v266_v4 = vld [vmem:[%s836_s1] sm:$0xff]  ;;  %v267_v7 = vld [vmem:[%s836_s1 + $0x8] sm:$0xff]  ;;  %vm359_vm6 = vcmask 130048   ;;  %v357_v28 = vld [vmem:[%s838_s3 + $0x10] sm:$0xff]  ;;  %s630_s17 = sshll.u32 %s846_s18, 5 }
   0xe   : > { %278 = vperm.xlu0 %662, %v270_v0   ;;  %s254_s27 = scalar_lea.vmem %s835_s0, %s629_s24  ;;  %v355_v25 = vld [vmem:[%s838_s3] sm:$0xff]  ;;  %v356_v26 = vld [vmem:[%s838_s3 + $0x8] sm:$0xff]  ;;  %v358_v29 = vld [vmem:[%s838_s3 + $0x18] sm:$0xff]  ;;  %s779_s24 = scalar_lea.vmem %s839_s4, %s630_s17  ;;  %vm434_vm7 = vcmask 7168   ;;  %v688_v35 = vmov 0.0  }
   0xf   : > { %v268_v2 = vld [vmem:[%s254_s27] sm:$0xff]  ;;  %435 = vst.msk [vmem:[%s779_s24] sm:$0xff] %vm434_vm7, %v688_v35  ;;  %s788_s26 = scalar_lea.vmem %s840_s5, %s630_s17 }
  0x10   : > { %282 = vst [vmem:[#allocation1] ss:$2 sm:$0xff] %v268_v2 }
  0x11   : > { %436 = vst.msk [vmem:[%s779_s24 + $0x8] sm:$0xff] %vm434_vm7, %v688_v35 }
  0x12   : > { %437 = vst.msk [vmem:[%s779_s24 + $0x10] sm:$0xff] %vm434_vm7, %v688_v35 }
  0x13   : > { %438 = vst.msk [vmem:[%s779_s24 + $0x18] sm:$0xff] %vm434_vm7, %v688_v35 }
  0x14   : > { %439 = vst.msk [vmem:[%s788_s26] sm:$0xff] %vm434_vm7, %v688_v35 }
  0x15   : > { %440 = vst.msk [vmem:[%s788_s26 + $0x8] sm:$0xff] %vm434_vm7, %v688_v35 }
  0x16   : > { %273 = vperm.xlu0 %662, %v269_v3   ;;  %441 = vst.msk [vmem:[%s788_s26 + $0x10] sm:$0xff] %vm434_vm7, %v688_v35  ;;  %v443_v55 = vld [vmem:[%s779_s24] sm:$0xff] }
  0x17   : > { %v283_v5 = vld.sshfl [vmem:[#allocation1] sm:$0xff pattern:$0x75316420]  ;;  %v284_v6 = vld.sshfl [vmem:[#allocation1 + $0x8] sm:$0xff pattern:$0x75316420] }
  0x18   : > { %613 = vmatpush.msk.msra.mxu0 %vm292_vm0, %v283_v5  ;;  %616 = vmatpush.msk.msra.mxu1 %vm292_vm0, %v284_v6  ;;  %442 = vst.msk [vmem:[%s788_s26 + $0x18] sm:$0xff] %vm434_vm7, %v688_v35  ;;  %v444_v61 = vld [vmem:[%s779_s24 + $0x8] sm:$0xff] }
  0x19   : > { %614 = vmatmul.msk.f32.vlgmr.msra.gmra.mxu0 %vm285_vm1, %v266_v4  ;;  %617 = vmatmul.msk.f32.vlgmr.msra.gmra.mxu1 %vm285_vm1, %v266_v4  ;;  %v445_v0 = vld [vmem:[%s779_s24 + $0x10] sm:$0xff] }
  0x1a   : > { %v446_v6 = vld [vmem:[%s779_s24 + $0x18] sm:$0xff] }
  0x1b   : > { %v468_v57 = vld [vmem:[%s788_s26] sm:$0xff] }
  0x1c   : > { %v469_v2 = vld [vmem:[%s788_s26 + $0x8] sm:$0xff] }
  0x21   : > { %615 = vmatmul.msk.f32.gmra.mxu0 %vm285_vm1, %v267_v7  ;;  %618 = vmatmul.msk.f32.gmra.mxu1 %vm285_vm1, %v267_v7 }
  0x80   : > { %v279_v8 = vpop.permute.xlu0 %278 }
  0x88   : > { %v274_v11 = vpop.permute.xlu0 %273 }
  0x96   : > { %v314_v9 = vpop.f32.mrf.mxu0  ;;  %v337_v10 = vpop.f32.mrf.mxu1 }
  0x97   : > { %v315_v12 = vadd.f32 %v314_v9, %v274_v11  ;;  %v338_v13 = vadd.f32 %v337_v10, %v274_v11 }
  0x99   : > { %v347_v18 = vmul.f32 0.2, %v315_v12  ;;  %vm343_vm4 = vcmp.ge.f32.partialorder %v315_v12, 0.0  ;;  %v348_v21 = vmul.f32 0.2, %v338_v13  ;;  %vm344_vm5 = vcmp.ge.f32.partialorder %v338_v13, 0.0 }
  0x9b   : > { %v351_v24 = vsel %vm343_vm4, %v315_v12, %v347_v18  ;;  %v352_v27 = vsel %vm344_vm5, %v338_v13, %v348_v21  ;;  %v470_v12 = vld [vmem:[%s788_s26 + $0x10] sm:$0xff] }
  0x9e   : > { %v317_v14 = vpop.f32.mrf.mxu0  ;;  %v340_v15 = vpop.f32.mrf.mxu1 }
  0x9f   : > { %v318_v16 = vadd.f32 %v317_v14, %v279_v8  ;;  %v341_v17 = vadd.f32 %v340_v15, %v279_v8  ;;  %v471_v8 = vld [vmem:[%s788_s26 + $0x18] sm:$0xff] }
  0xa1   : > { %vm345_vm2 = vcmp.ge.f32.partialorder %v318_v16, 0.0  ;;  %v349_v19 = vmul.f32 0.2, %v318_v16  ;;  %vm346_vm3 = vcmp.ge.f32.partialorder %v341_v17, 0.0  ;;  %v350_v20 = vmul.f32 0.2, %v341_v17 }
  0xa3   : > { %v353_v22 = vsel %vm345_vm2, %v318_v16, %v349_v19  ;;  %v354_v23 = vsel %vm346_vm3, %v341_v17, %v350_v20 }
  0xa4   : > { %386 = vmatpush.msrb.mxu0 %v353_v22  ;;  %632 = vmatpush.msra.mxu2 %v353_v22 }
  0xa5   : > { %415 = vmatpush.msrb.mxu1 %v354_v23  ;;  %634 = vmatpush.msra.mxu3 %v354_v23 }
  0xa6   : > { %387 = vmatpush.msrb.mxu0 %v351_v24  ;;  %633 = vmatpush.msra.mxu2 %v351_v24 }
  0xa7   : > { %416 = vmatpush.msrb.mxu1 %v352_v27  ;;  %635 = vmatpush.msra.mxu3 %v352_v27 }
  0xa8   : > { %619 = vmatmul.msk.f32.vlgmr.msrb.gmra.mxu0 %vm359_vm6, %v355_v25  ;;  %620 = vmatmul.msk.f32.vlgmr.msra.gmra.mxu2 %vm359_vm6, %v356_v26 }
  0xa9   : > { %623 = vmatmul.msk.f32.vlgmr.msrb.gmra.mxu1 %vm359_vm6, %v355_v25  ;;  %624 = vmatmul.msk.f32.vlgmr.msra.gmra.mxu3 %vm359_vm6, %v356_v26 }
  0xb0   : > { %621 = vmatmul.msk.f32.gmra.mxu2 %vm359_vm6, %v357_v28 }
  0xb1   : > { %625 = vmatmul.msk.f32.gmra.mxu3 %vm359_vm6, %v357_v28 }
  0xb8   : > { %622 = vmatmul.msk.f32.gmra.mxu2 %vm359_vm6, %v358_v29 }
  0xb9   : > { %626 = vmatmul.msk.f32.gmra.mxu3 %vm359_vm6, %v358_v29 }
 0x125   : > { %v389_v30 = vpop.f32.mrf.mxu0 }
 0x126   : > { %v472_v31 = vmul.f32 %v389_v30, %v389_v30  ;;  %v418_v32 = vpop.f32.mrf.mxu1 }
 0x127   : > { %v473_v33 = vmul.f32 %v418_v32, %v418_v32  ;;  %v447_v34 = vadd.f32 %v418_v32, %v389_v30 }
 0x129   : > { %448 = vadd.xlane.f32.xlu1 %v447_v34  ;;  %v480_v36 = vadd.f32 %v473_v33, %v472_v31 }
 0x12b   : > { %v392_v37 = vpop.f32.mrf.mxu2  ;;  %481 = vadd.xlane.f32.xlu0 %v480_v36 }
 0x12c   : > { %v421_v38 = vpop.f32.mrf.mxu3  ;;  %v474_v40 = vmul.f32 %v392_v37, %v392_v37 }
 0x12d   : > { %v450_v39 = vadd.f32 %v421_v38, %v392_v37  ;;  %v475_v41 = vmul.f32 %v421_v38, %v421_v38 }
 0x12f   : > { %v483_v45 = vadd.f32 %v475_v41, %v474_v40 }
 0x131   : > { %451 = vadd.xlane.f32.xlu1 %v450_v39 }
 0x133   : > { %v395_v42 = vpop.f32.mrf.mxu2 }
 0x134   : > { %v424_v43 = vpop.f32.mrf.mxu3  ;;  %v476_v52 = vmul.f32 %v395_v42, %v395_v42 }
 0x135   : > { %v453_v44 = vadd.f32 %v424_v43, %v395_v42  ;;  %v477_v53 = vmul.f32 %v424_v43, %v424_v43 }
 0x137   : > { %454 = vadd.xlane.f32.xlu2 %v453_v44  ;;  %v486_v54 = vadd.f32 %v477_v53, %v476_v52 }
 0x139   : > { %484 = vadd.xlane.f32.xlu1 %v483_v45 }
 0x13b   : > { %v398_v46 = vpop.f32.mrf.mxu2 }
 0x13c   : > { %v478_v47 = vmul.f32 %v398_v46, %v398_v46  ;;  %v427_v48 = vpop.f32.mrf.mxu3 }
 0x13d   : > { %v456_v49 = vadd.f32 %v427_v48, %v398_v46  ;;  %v479_v50 = vmul.f32 %v427_v48, %v427_v48 }
 0x13f   : > { %457 = vadd.xlane.f32.xlu2 %v456_v49  ;;  %v489_v51 = vadd.f32 %v479_v50, %v478_v47 }
 0x141   : > { %490 = vadd.xlane.f32.xlu1 %v489_v51 }
 0x147   : > { %487 = vadd.xlane.f32.xlu2 %v486_v54 }
 0x19c   : > { %v449_v56 = vpop.xlane.xlu1 %448 }
 0x19d   : > { %v459_v58 = vadd.f32 %v449_v56, %v443_v55 }
 0x19e   : > { %v482_v59 = vpop.xlane.xlu0 %481 }
 0x19f   : > { %464 = vst.msk [vmem:[%s779_s24] sm:$0xff] %vm434_vm7, %v459_v58  ;;  %v492_v60 = vadd.f32 %v482_v59, %v468_v57 }
 0x1a1   : > { %496 = vst.msk [vmem:[%s788_s26] sm:$0xff] %vm434_vm7, %v492_v60 }
 0x1a4   : > { %v452_v62 = vpop.xlane.xlu1 %451 }
 0x1a5   : > { %v460_v63 = vadd.f32 %v452_v62, %v444_v61 }
 0x1a7   : > { %465 = vst.msk [vmem:[%s779_s24 + $0x8] sm:$0xff] %vm434_vm7, %v460_v63 }
 0x1aa   : > { %v455_v1 = vpop.xlane.xlu2 %454 }
 0x1ab   : > { %v461_v3 = vadd.f32 %v455_v1, %v445_v0 }
 0x1ac   : > { %v485_v4 = vpop.xlane.xlu1 %484 }
 0x1ad   : > { %466 = vst.msk [vmem:[%s779_s24 + $0x10] sm:$0xff] %vm434_vm7, %v461_v3  ;;  %v493_v5 = vadd.f32 %v485_v4, %v469_v2 }
 0x1af   : > { %497 = vst.msk [vmem:[%s788_s26 + $0x8] sm:$0xff] %vm434_vm7, %v493_v5 }
 0x1b2   : > { %v458_v7 = vpop.xlane.xlu2 %457 }
 0x1b3   : > { %v462_v9 = vadd.f32 %v458_v7, %v446_v6 }
 0x1b4   : > { %v491_v10 = vpop.xlane.xlu1 %490 }
 0x1b5   : > { %467 = vst.msk [vmem:[%s779_s24 + $0x18] sm:$0xff] %vm434_vm7, %v462_v9  ;;  %v495_v11 = vadd.f32 %v491_v10, %v471_v8 }
 0x1b7   : > { %499 = vst.msk [vmem:[%s788_s26 + $0x18] sm:$0xff] %vm434_vm7, %v495_v11 }
 0x1ba   : > { %v488_v13 = vpop.xlane.xlu2 %487 }
 0x1bb   : > { %v494_v14 = vadd.f32 %v488_v13, %v470_v12 }
 0x1bd   : > { %498 = vst.msk [vmem:[%s788_s26 + $0x10] sm:$0xff] %vm434_vm7, %v494_v14 }
 0x1be PF: > { %s16_s20 = sadd.s32 1, %s685_s20   ;;  %s841_s18 = smov %s681_s19 }
 0x1bf   : > { %p13_p5 = scmp.ge.s32.totalorder %s16_s20, 4   ;;  %s842_s19 = smov %s844_s21 }
 0x1c1   :  { %15 = sbr.rel (!%p13_p5) target bundleno = 2 (0x2), region = 82 }

// kernel: pixel_discriminator.4
= control target key start
LH: loop header
LB: loop body
LE: loop exit
PB: predicated region body
PF: predicated region fallthrough
CT: control target
= control target key end

     0   :  { %s760_s21 = smov 0   ;;  %s762_s22 = smov 0   ;;  %s853_s0 = inlined_call_operand.vmem [shape: f32[2,4,256], index: 0, kind: input, shape index: {}]   ;;  %s854_s1 = inlined_call_operand.vmem [shape: f32[16,4], index: 1, kind: input, shape index: {}]   ;;  %s855_s2 = inlined_call_operand.vmem [shape: f32[16,1], index: 2, kind: input, shape index: {}]   ;;  %s856_s3 = inlined_call_operand.vmem [shape: f32[32,16], index: 3, kind: input, shape index: {}]   ;;  %s857_s4 = inlined_call_operand.vmem [shape: f32[32,1], index: 4, kind: input, shape index: {}]   ;;  %s858_s5 = inlined_call_operand.vmem [shape: f32[32,1], index: 5, kind: input, shape index: {}]   ;;  %s859_s6 = inlined_call_operand.vmem [shape: f32[2,1,256], index: 6, kind: output, shape index: {}]  }
   0x1   :  { %s764_s23 = smov 0  }
   0x2 LB: > { %s28_s24 = sadd.s32 1, %s718_s22  ;;  %p647_p0 = scmp.ge.s32.totalorder %s722_s23, 1  ;;  %s722_s23 = sphi %s764_s23, %s16_s23   ;;  %s718_s22 = sphi %s762_s22, %s861_s22   ;;  %s714_s21 = sphi %s760_s21, %s860_s21  }
   0x3   : > { %p30_p1 = scmp.ge.s32.totalorder %s28_s24, 2  ;;  %p233_p2 = scmp.lt.s32.totalorder %s722_s23, 3 }
   0x5   : > { %s863_s24 = smov (%p30_p1, %s28_s24), 0  ;;  %p234_p3 = pnand %p647_p0, %p233_p2 }
   0x6   : > { %p271_p4 = scmp.lt.s32.totalorder (!%p234_p3), %s714_s21, 1 }
   0x7   : > { %237 = sbr.rel (%p234_p3) target bundleno = 342 (0x156), region = 44 }
   0xc   : > { %v293_v0 = vld [vmem:[%s855_s2 + $0x8] sm:$0xff]  ;;  %v724_v1 = vmov 0   ;;  %s865_s21 = smov (!%p271_p4, %s714_s21), 1  ;;  %v292_v3 = vld [vmem:[%s855_s2] sm:$0xff]  ;;  %vm315_vm0 = vcmask 1043456   ;;  %vm308_vm1 = vcmask 31744  }
   0xd   : > { %697 = vset.pattern.permute.xlu0 %v724_v1  ;;  %698 = vset.pattern.permute.xlu1 %v724_v1  ;;  %s667_s27 = sshll.u32 %s865_s21, 3  ;;  %v289_v4 = vld [vmem:[%s854_s1] sm:$0xff]  ;;  %v290_v8 = vld [vmem:[%s854_s1 + $0x8] sm:$0xff]  ;;  %v504_v9 = vld [vmem:[%s858_s5 + $0x18] sm:$0xff]  ;;  %vm406_vm6 = vcmask 130048   ;;  %s650_s17 = sshll.u32 %s865_s21, 1 }
   0xe   : > { %301 = vperm.xlu0 %697, %v293_v0   ;;  %699 = vset.pattern.permute.xlu2 %v724_v1  ;;  %s278_s30 = scalar_lea.vmem %s853_s0, %s667_s27  ;;  %v501_v7 = vld [vmem:[%s858_s5] sm:$0xff]  ;;  %v383_v12 = vld [vmem:[%s857_s4 + $0x8] sm:$0xff]  ;;  %v384_v16 = vld [vmem:[%s857_s4 + $0x10] sm:$0xff]  ;;  %vm554_vm15 = vcmask 1040384   ;;  %s287_s20 = scalar_lea.vmem %s859_s6, %s650_s17 }
   0xf   : > { %v291_v2 = vld [vmem:[%s278_s30] sm:$0xff]  ;;  %v502_v15 = vld [vmem:[%s858_s5 + $0x8] sm:$0xff]  ;;  %398 = vperm.xlu2 %699, %v384_v16   ;;  %v385_v25 = vld [vmem:[%s857_s4 + $0x18] sm:$0xff] }
  0x10   : > { %305 = vst [vmem:[#allocation1] ss:$2 sm:$0xff] %v291_v2  ;;  %v382_v10 = vld [vmem:[%s857_s4] sm:$0xff]  ;;  %v379_v33 = vld [vmem:[%s856_s3 + $0x8] sm:$0xff]  ;;  %v503_v35 = vld [vmem:[%s858_s5 + $0x10] sm:$0xff] }
  0x11   : > { %388 = vperm.xlu1 %698, %v382_v10   ;;  %v378_v32 = vld [vmem:[%s856_s3] sm:$0xff]  ;;  %v380_v36 = vld [vmem:[%s856_s3 + $0x10] sm:$0xff]  ;;  %v381_v37 = vld [vmem:[%s856_s3 + $0x18] sm:$0xff] }
  0x16   : > { %296 = vperm.xlu0 %697, %v292_v3  }
  0x17   : > { %v306_v5 = vld.sshfl [vmem:[#allocation1] sm:$0xff pattern:$0x75316420]  ;;  %v307_v6 = vld.sshfl [vmem:[#allocation1 + $0x8] sm:$0xff pattern:$0x75316420]  ;;  %403 = vperm.xlu2 %699, %v385_v25  }
  0x18   : > { %651 = vmatpush.msk.msra.mxu0 %vm315_vm0, %v306_v5  ;;  %654 = vmatpush.msk.msra.mxu1 %vm315_vm0, %v307_v6 }
  0x19   : > { %652 = vmatmul.msk.f32.vlgmr.msra.gmra.mxu0 %vm308_vm1, %v289_v4  ;;  %655 = vmatmul.msk.f32.vlgmr.msra.gmra.mxu1 %vm308_vm1, %v289_v4 }
  0x1a   : > { %393 = vperm.xlu1 %698, %v383_v12  }
  0x1e   : > { %507 = vperm.xlu0 %697, %v501_v7  }
  0x1f   : > { %517 = vperm.xlu2 %699, %v503_v35  }
  0x21   : > { %653 = vmatmul.msk.f32.gmra.mxu0 %vm308_vm1, %v290_v8  ;;  %656 = vmatmul.msk.f32.gmra.mxu1 %vm308_vm1, %v290_v8 }
  0x22   : > { %512 = vperm.xlu1 %698, %v502_v15  }
  0x26   : > { %522 = vperm.xlu0 %697, %v504_v9  }
  0x69   : > { %v399_v39 = vpop.permute.xlu2 %398 }
  0x71   : > { %v404_v48 = vpop.permute.xlu2 %403 }
  0x79   : > { %v518_v7 = vpop.permute.xlu2 %517 }
  0x80   : > { %v302_v11 = vpop.permute.xlu0 %301 }
  0x83   : > { %v389_v38 = vpop.permute.xlu1 %388 }
  0x88   : > { %v297_v17 = vpop.permute.xlu0 %296 }
  0x8c   : > { %v394_v42 = vpop.permute.xlu1 %393 }
  0x90   : > { %v508_v56 = vpop.permute.xlu0 %507 }
  0x94   : > { %v513_v0 = vpop.permute.xlu1 %512 }
  0x96   : > { %v337_v13 = vpop.f32.mrf.mxu0  ;;  %v360_v14 = vpop.f32.mrf.mxu1 }
  0x97   : > { %v338_v18 = vadd.f32 %v337_v13, %v297_v17  ;;  %v361_v19 = vadd.f32 %v360_v14, %v297_v17 }
  0x99   : > { %v370_v24 = vmul.f32 0.2, %v338_v18  ;;  %vm366_vm4 = vcmp.ge.f32.partialorder %v338_v18, 0.0  ;;  %v371_v28 = vmul.f32 0.2, %v361_v19  ;;  %vm367_vm5 = vcmp.ge.f32.partialorder %v361_v19, 0.0 }
  0x9b   : > { %v374_v31 = vsel %vm366_vm4, %v338_v18, %v370_v24  ;;  %v375_v34 = vsel %vm367_vm5, %v361_v19, %v371_v28  ;;  %v523_v18 = vpop.permute.xlu0 %522 }
  0x9e   : > { %v340_v20 = vpop.f32.mrf.mxu0  ;;  %v363_v21 = vpop.f32.mrf.mxu1 }
  0x9f   : > { %v341_v22 = vadd.f32 %v340_v20, %v302_v11  ;;  %v364_v23 = vadd.f32 %v363_v21, %v302_v11 }
  0xa1   : > { %vm368_vm2 = vcmp.ge.f32.partialorder %v341_v22, 0.0  ;;  %v372_v26 = vmul.f32 0.2, %v341_v22  ;;  %vm369_vm3 = vcmp.ge.f32.partialorder %v364_v23, 0.0  ;;  %v373_v27 = vmul.f32 0.2, %v364_v23 }
  0xa3   : > { %v376_v29 = vsel %vm368_vm2, %v341_v22, %v372_v26  ;;  %v377_v30 = vsel %vm369_vm3, %v364_v23, %v373_v27 }
  0xa4   : > { %433 = vmatpush.msrb.mxu0 %v376_v29  ;;  %668 = vmatpush.msra.mxu2 %v376_v29 }
  0xa5   : > { %462 = vmatpush.msrb.mxu1 %v377_v30  ;;  %670 = vmatpush.msra.mxu3 %v377_v30 }
  0xa6   : > { %434 = vmatpush.msrb.mxu0 %v374_v31  ;;  %669 = vmatpush.msra.mxu2 %v374_v31 }
  0xa7   : > { %463 = vmatpush.msrb.mxu1 %v375_v34  ;;  %671 = vmatpush.msra.mxu3 %v375_v34 }
  0xa8   : > { %657 = vmatmul.msk.f32.vlgmr.msrb.gmra.mxu0 %vm406_vm6, %v378_v32  ;;  %658 = vmatmul.msk.f32.vlgmr.msra.gmra.mxu2 %vm406_vm6, %v379_v33 }
  0xa9   : > { %661 = vmatmul.msk.f32.vlgmr.msrb.gmra.mxu1 %vm406_vm6, %v378_v32  ;;  %662 = vmatmul.msk.f32.vlgmr.msra.gmra.mxu3 %vm406_vm6, %v379_v33 }
  0xb0   : > { %659 = vmatmul.msk.f32.gmra.mxu2 %vm406_vm6, %v380_v36 }
  0xb1   : > { %663 = vmatmul.msk.f32.gmra.mxu3 %vm406_vm6, %v380_v36 }
  0xb8   : > { %660 = vmatmul.msk.f32.gmra.mxu2 %vm406_vm6, %v381_v37 }
  0xb9   : > { %664 = vmatmul.msk.f32.gmra.mxu3 %vm406_vm6, %v381_v37 }
 0x125   : > { %v436_v43 = vpop.f32.mrf.mxu0 }
 0x126   : > { %v465_v44 = vpop.f32.mrf.mxu1  ;;  %v437_v47 = vadd.f32 %v436_v43, %v389_v38 }
 0x127   : > { %v466_v49 = vadd.f32 %v465_v44, %v389_v38  ;;  %v557_v38 = vlaneseq }
 0x128   : > { %v485_v57 = vmul.f32 0.2, %v437_v47  ;;  %vm477_vm9 = vcmp.ge.f32.partialorder %v437_v47, 0.0 }
 0x129   : > { %v486_v59 = vmul.f32 0.2, %v466_v49  ;;  %vm478_vm11 = vcmp.ge.f32.partialorder %v466_v49, 0.0  ;;  %vm559_vm0 = vcmp.lt.s32.totalorder %v557_v38, 256 }
 0x12a   : > { %v493_v63 = vsel %vm477_vm9, %v437_v47, %v485_v57 }
 0x12b   : > { %v439_v40 = vpop.f32.mrf.mxu2  ;;  %v494_v2 = vsel %vm478_vm11, %v466_v49, %v486_v59  ;;  %v525_v10 = vmul.f32 %v508_v56, %v493_v63 }
 0x12c   : > { %v468_v41 = vpop.f32.mrf.mxu3  ;;  %v440_v45 = vadd.f32 %v439_v40, %v394_v42  ;;  %v526_v13 = vmul.f32 %v508_v56, %v494_v2 }
 0x12d   : > { %v469_v46 = vadd.f32 %v468_v41, %v394_v42 }
 0x12e   : > { %v487_v51 = vmul.f32 0.2, %v440_v45  ;;  %vm479_vm7 = vcmp.ge.f32.partialorder %v440_v45, 0.0 }
 0x12f   : > { %v488_v54 = vmul.f32 0.2, %v469_v46  ;;  %vm480_vm8 = vcmp.ge.f32.partialorder %v469_v46, 0.0 }
 0x130   : > { %v495_v61 = vsel %vm479_vm7, %v440_v45, %v487_v51 }
 0x131   : > { %v496_v62 = vsel %vm480_vm8, %v469_v46, %v488_v54  ;;  %v527_v3 = vmul.f32 %v513_v0, %v495_v61 }
 0x132   : > { %v528_v6 = vmul.f32 %v513_v0, %v496_v62 }
 0x133   : > { %v442_v50 = vpop.f32.mrf.mxu2  ;;  %v533_v16 = vadd.f32 %v527_v3, %v525_v10 }
 0x134   : > { %v443_v52 = vadd.f32 %v442_v50, %v399_v39  ;;  %v471_v53 = vpop.f32.mrf.mxu3  ;;  %v542_v19 = vadd.f32 %v528_v6, %v526_v13 }
 0x135   : > { %v472_v55 = vadd.f32 %v471_v53, %v399_v39 }
 0x136   : > { %v489_v58 = vmul.f32 0.2, %v443_v52  ;;  %vm481_vm10 = vcmp.ge.f32.partialorder %v443_v52, 0.0 }
 0x137   : > { %v490_v60 = vmul.f32 0.2, %v472_v55  ;;  %vm482_vm12 = vcmp.ge.f32.partialorder %v472_v55, 0.0 }
 0x138   : > { %v497_v1 = vsel %vm481_vm10, %v443_v52, %v489_v58 }
 0x139   : > { %v498_v4 = vsel %vm482_vm12, %v472_v55, %v490_v60  ;;  %v529_v11 = vmul.f32 %v518_v7, %v497_v1 }
 0x13a   : > { %v530_v14 = vmul.f32 %v518_v7, %v498_v4 }
 0x13b   : > { %v445_v5 = vpop.f32.mrf.mxu2  ;;  %v534_v21 = vadd.f32 %v533_v16, %v529_v11 }
 0x13c   : > { %v446_v8 = vadd.f32 %v445_v5, %v404_v48  ;;  %v474_v9 = vpop.f32.mrf.mxu3  ;;  %v543_v24 = vadd.f32 %v542_v19, %v530_v14 }
 0x13d   : > { %v475_v12 = vadd.f32 %v474_v9, %v404_v48 }
 0x13e   : > { %vm483_vm13 = vcmp.ge.f32.partialorder %v446_v8, 0.0  ;;  %v491_v15 = vmul.f32 0.2, %v446_v8 }
 0x13f   : > { %vm484_vm14 = vcmp.ge.f32.partialorder %v475_v12, 0.0  ;;  %v492_v17 = vmul.f32 0.2, %v475_v12 }
 0x140   : > { %v499_v20 = vsel %vm483_vm13, %v446_v8, %v491_v15 }
 0x141   : > { %v531_v22 = vmul.f32 %v523_v18, %v499_v20  ;;  %v500_v23 = vsel %vm484_vm14, %v475_v12, %v492_v17 }
 0x142   : > { %v532_v25 = vmul.f32 %v523_v18, %v500_v23 }
 0x143   : > { %v535_v26 = vadd.f32 %v534_v21, %v531_v22 }
 0x144   : > { %v544_v27 = vadd.f32 %v543_v24, %v532_v25 }
 0x145   : > { %v536_v28 = vrot.slane %v535_v26, 4 }
 0x146   : > { %v545_v29 = vrot.slane %v544_v27, 4 }
 0x147   : > { %v537_v30 = vadd.f32 %v536_v28, %v535_v26 }
 0x148   : > { %v546_v31 = vadd.f32 %v545_v29, %v544_v27 }
 0x149   : > { %v538_v32 = vrot.slane %v537_v30, 2 }
 0x14a   : > { %v547_v33 = vrot.slane %v546_v31, 2 }
 0x14b   : > { %v539_v34 = vadd.f32 %v538_v32, %v537_v30 }
 0x14c   : > { %v548_v35 = vadd.f32 %v547_v33, %v546_v31 }
 0x14d   : > { %v540_v36 = vrot.slane %v539_v34, 1 }
 0x14e   : > { %v549_v37 = vrot.slane %v548_v35, 1 }
 0x14f   : > { %v541_v40 = vadd.f32 %v540_v36, %v539_v34 }
 0x150   : > { %v550_v39 = vadd.f32 %v549_v37, %v548_v35 }
 0x152   : > { %v553_v41 = vrot.slane %v550_v39, 7 }
 0x154   : > { %v555_v42 = vsel %vm554_vm15, %v541_v40, %v553_v41 }
 0x155   : > { %561 = vst.msk [vmem:[%s287_s20] sm:$0x3] %vm559_vm0, %v555_v42 }
 0x156 PF: > { %s16_s23 = sadd.s32 1, %s722_s23   ;;  %s860_s21 = smov %s718_s22 }
 0x157   : > { %p13_p5 = scmp.ge.s32.totalorder %s16_s23, 4   ;;  %s861_s22 = smov %s863_s24 }
 0x159   :  { %15 = sbr.rel (!%p13_p5) target bundleno = 2 (0x2), region = 74 }

</bundles_post_ra>
